<compile_context>
chip_gen: v5e
topology: v5e:2x2
jax: 0.10.0
libtpu: 0.0.40
codegen_flags: <defaults>
</compile_context>

<pallas_src>
import math

import jax
import jax.numpy as jnp
from jax.experimental import pallas as pl
from jax.experimental.pallas import tpu as pltpu

_TILE_BUDGET_BYTES = 4 << 20   # ~4 MiB per buffer (amortizes per-step overhead on v7x)
_VMEM_LIMIT_BYTES = 32 << 20   # 3 operands x 2 buffers x 4 MiB = 24 MiB < 32 MiB


def _pe_add_rows_kernel(x_ref, pe_ref, o_ref):
    # x_ref / o_ref: (TR, C) row-tile of one batch element (batch dim squeezed)
    # pe_ref:        (TR, C) matching positional-encoding tile (any dtype)
    o_ref[...] = x_ref[...] + pe_ref[...].astype(o_ref.dtype)


def _pe_add_batched_kernel(x_ref, pe_ref, o_ref):
    # x_ref / o_ref: (Bb, R, C) batch-block; pe_ref: (R, C) broadcast over batch
    o_ref[...] = x_ref[...] + pe_ref[...].astype(o_ref.dtype)[None]


def _sublane_pack(itemsize: int) -> int:
    return {4: 8, 2: 16, 1: 32}.get(itemsize, 8)


def make_positional_encoding(d_model: int, seq_len: int, dropout: float = 0.0,
                             dtype=jnp.float32):
    """Returns (pe_table, apply_fn) mirroring the PyTorch module."""
    position = jnp.arange(seq_len, dtype=jnp.float32)[:, None]              # (S, 1)
    div_term = jnp.exp(
        jnp.arange(0, d_model, 2, dtype=jnp.float32)
        * (-math.log(10000.0) / d_model)
    )                                                                        # (ceil(D/2),)
    angles = position * div_term                                             # (S, ceil(D/2))
    pe = jnp.zeros((seq_len, d_model), dtype=jnp.float32)
    pe = pe.at[:, 0::2].set(jnp.sin(angles))
    pe = pe.at[:, 1::2].set(jnp.cos(angles)[:, : d_model // 2])  # safe for odd d_model
    pe = pe.astype(dtype)  # cast once at construction, never per apply() call

    def apply(x, *, donate_x: bool = False):
        B, S, D = x.shape
        assert D == d_model and S <= seq_len
        pe_slice = pe[:S]                                   # self.pe[:, :x.shape[1], :]
        itemsize = jnp.dtype(x.dtype).itemsize
        pe_itemsize = jnp.dtype(pe.dtype).itemsize

        # ---- present a lane-dense (multiple-of-128) last dim to the kernel ----
        padded_tail = False
        if D % 128 == 0:
            R, C = S, D
            x2, pe2 = x, pe_slice
        elif (S * D) % 128 == 0:
            C = 128
            R = (S * D) // 128
            x2 = x.reshape(B, R, C)
            pe2 = pe_slice.reshape(R, C)
        else:
            # ragged fallback: flatten and pad the tail up to lane width 128 so
            # stores stay unmasked full-lane vst.
            # TODO(synk): jnp.pad here is an extra wrapper-side copy of x; only
            #             taken when neither D nor S*D folds to 128 lanes.
            flat = S * D
            padded = ((flat + 127) // 128) * 128
            pad = padded - flat
            x2 = jnp.pad(x.reshape(B, flat), ((0, 0), (0, pad)))
            pe2 = jnp.pad(pe_slice.reshape(flat), (0, pad))
            C = 128
            R = padded // 128
            x2 = x2.reshape(B, R, C)
            pe2 = pe2.reshape(R, C)
            padded_tail = True

        sublane = _sublane_pack(itemsize)
        row_bytes = C * itemsize

        # row-tile: multiple of the sublane pack, ~_TILE_BUDGET_BYTES per buffer
        if R <= sublane:
            tr = R
        else:
            target_rows = max(sublane, _TILE_BUDGET_BYTES // max(1, row_bytes))
            tr = (min(target_rows, R) // sublane) * sublane
            tr = max(sublane, tr)
            if tr >= R:
                tr = R

        cost = pl.CostEstimate(
            flops=int(B * R * C),
            transcendentals=0,
            bytes_accessed=int(2 * B * R * C * itemsize + R * C * pe_itemsize),
        )
        alias = {0: 0} if donate_x else {}

        if tr == R and B > 1:
            # Whole (folded) sequence fits in one row tile -> block the BATCH
            # axis instead, keeping per-step DMA payload near the tile budget.
            bb = max(1, min(B, _TILE_BUDGET_BYTES // max(1, R * C * itemsize)))
            n_b = pl.cdiv(B, bb)
            if n_b < 2 and B >= 2:  # give v7x's two TensorCores >=2 grid steps
                bb = pl.cdiv(B, 2)
                n_b = pl.cdiv(B, bb)
            out = pl.pallas_call(
                _pe_add_batched_kernel,
                out_shape=jax.ShapeDtypeStruct((B, R, C), x.dtype),
                grid_spec=pltpu.PrefetchScalarGridSpec(
                    num_scalar_prefetch=0,
                    grid=(n_b,),
                    in_specs=[
                        pl.BlockSpec((bb, R, C), lambda b: (b, 0, 0)),
                        pl.BlockSpec((R, C), lambda b: (0, 0)),
                    ],
                    out_specs=pl.BlockSpec((bb, R, C), lambda b: (b, 0, 0)),
                ),
                compiler_params=pltpu.CompilerParams(
                    dimension_semantics=("parallel",),
                    vmem_limit_bytes=_VMEM_LIMIT_BYTES,
                ),
                cost_estimate=cost,
                input_output_aliases=alias,
            )(x2, pe2)
        else:
            n_row_tiles = pl.cdiv(R, tr)
            if n_row_tiles < 2 and B == 1 and R >= 2 * sublane:
                # single-step grid: split rows so both v7x TCs have work
                tr = ((pl.cdiv(R, 2) + sublane - 1) // sublane) * sublane
                n_row_tiles = pl.cdiv(R, tr)
            out = pl.pallas_call(
                _pe_add_rows_kernel,
                out_shape=jax.ShapeDtypeStruct((B, R, C), x.dtype),
                grid_spec=pltpu.PrefetchScalarGridSpec(
                    num_scalar_prefetch=0,
                    # row-tiles OUTER, batch INNER: pe block index is constant
                    # across the inner loop -> pe re-DMA'd once per row tile.
                    grid=(n_row_tiles, B),
                    in_specs=[
                        pl.BlockSpec((pl.Squeezed(), tr, C),
                                     lambda s, b: (b, s, 0)),
                        pl.BlockSpec((tr, C), lambda s, b: (s, 0)),
                    ],
                    out_specs=pl.BlockSpec((pl.Squeezed(), tr, C),
                                           lambda s, b: (b, s, 0)),
                ),
                compiler_params=pltpu.CompilerParams(
                    dimension_semantics=("parallel", "parallel"),
                    vmem_limit_bytes=_VMEM_LIMIT_BYTES,
                ),
                cost_estimate=cost,
                input_output_aliases=alias,
            )(x2, pe2)

        if padded_tail:
            out = out.reshape(B, R * C)[:, : S * D]
        return out.reshape(B, S, D)

    return pe, apply


if __name__ == "__main__":
    batch, seq_len, d_model = 2, 8, 32
    key = jax.random.PRNGKey(0)
    x = jax.random.normal(key, (batch, seq_len, d_model), dtype=jnp.float32)

    pe, apply_fn = make_positional_encoding(d_model=d_model,
                                            seq_len=seq_len,
                                            dropout=0.0,
                                            dtype=jnp.float32)

    out = apply_fn(x)
    jax.block_until_ready(out)

    # reference check (pure JAX)
    ref = x + pe[None, :seq_len, :].astype(x.dtype)
    assert jnp.allclose(out, ref, atol=1e-6), "mismatch vs reference"

    print("KERNEL_OK")
</pallas_src>

<mosaic_0001>
module attributes {stable_mosaic.version = 11 : i64} {
  func.func @_pe_add_batched_kernel(%arg0: i32, %arg1: memref<1x2x128xf32, #tpu.memory_space<vmem>>, %arg2: memref<2x128xf32, #tpu.memory_space<vmem>>, %arg3: memref<1x2x128xf32, #tpu.memory_space<vmem>>) attributes {dimension_semantics = [#tpu.dimension_semantics<parallel>], iteration_bounds = array<i64: 2>, scalar_prefetch = 0 : i64, scratch_operands = 0 : i64, tpu.core_type = #tpu.core_type<tc>, window_params = [{transform_indices = @transform_0, window_bounds = array<i64: 1, 2, 128>}, {pipeline_mode = #tpu.pipeline_mode<synchronous>, transform_indices = @transform_1, window_bounds = array<i64: 2, 128>}, {transform_indices = @transform_2, window_bounds = array<i64: 1, 2, 128>}]} {
    %c0 = arith.constant 0 : index
    %c0_0 = arith.constant 0 : index
    %c0_1 = arith.constant 0 : index
    %0 = vector.load %arg1[%c0, %c0_0, %c0_1] : memref<1x2x128xf32, #tpu.memory_space<vmem>>, vector<1x2x128xf32>
    %c0_2 = arith.constant 0 : index
    %c0_3 = arith.constant 0 : index
    %1 = vector.load %arg2[%c0_2, %c0_3] : memref<2x128xf32, #tpu.memory_space<vmem>>, vector<2x128xf32>
    %2 = vector.shape_cast %1 : vector<2x128xf32> to vector<1x2x128xf32>
    %3 = arith.addf %0, %2 : vector<1x2x128xf32>
    %c0_4 = arith.constant 0 : index
    %c0_5 = arith.constant 0 : index
    %c0_6 = arith.constant 0 : index
    %4 = vector.load %arg3[%c0_4, %c0_5, %c0_6] : memref<1x2x128xf32, #tpu.memory_space<vmem>>, vector<1x2x128xf32>
    tpu.vector_store %arg3[%c0_4, %c0_5, %c0_6], %3 {strides = array<i32>} : memref<1x2x128xf32, #tpu.memory_space<vmem>>, vector<1x2x128xf32>,
    return
  }
  func.func @transform_0(%arg0: i32) -> (i32, i32, i32) {
    %c0_i32 = arith.constant 0 : i32
    %c0_i32_0 = arith.constant 0 : i32
    %c0_i32_1 = arith.constant 0 : i32
    return %arg0, %c0_i32, %c0_i32_0 : i32, i32, i32
  }
  func.func @transform_1(%arg0: i32) -> (i32, i32) {
    %c0_i32 = arith.constant 0 : i32
    %c0_i32_0 = arith.constant 0 : i32
    %c0_i32_1 = arith.constant 0 : i32
    return %c0_i32, %c0_i32_0 : i32, i32
  }
  func.func @transform_2(%arg0: i32) -> (i32, i32, i32) {
    %c0_i32 = arith.constant 0 : i32
    %c0_i32_0 = arith.constant 0 : i32
    %c0_i32_1 = arith.constant 0 : i32
    return %arg0, %c0_i32, %c0_i32_0 : i32, i32, i32
  }
}

</mosaic_0001>

<bundles_post_ra>
// kernel: tpu_custom_call.1
= control target key start
LH: loop header
LB: loop body
LE: loop exit
PB: predicated region body
PF: predicated region fallthrough
CT: control target
= control target key end

     0   :  { %7 = vsyncpa [#allocation3], 0  ;;  %s633_s0 = inlined_call_operand.hbm [shape: f32[2,2,128], index: 0, kind: input, shape index: {}]   ;;  %s634_s1 = inlined_call_operand.hbm [shape: f32[2,128], index: 1, kind: input, shape index: {}]   ;;  %s635_s2 = inlined_call_operand.hbm [shape: f32[2,2,128], index: 2, kind: output, shape index: {}]  }
   0x1   :  { %9 = vsyncpa [#allocation3 + $0x1], 0 }
   0x2   :  { %10 = vsyncpa [#allocation6], 0 }
   0x3   :  { %11 = vsyncpa [#allocation4], 0 }
   0x4   :  { %13 = vsyncpa [#allocation4 + $0x1], 0  ;;  %s495_s9 = smov 0   ;;  %s497_s10 = smov 0  }
   0x5   :  { %s499_s11 = smov 0   ;;  %s501_s12 = smov 0  }
   0x6 LB: > { %s516_s13 = sadd.s32 4294967295, %s477_s12   ;;  %s276_s14 = sadd.s32 4294967294, %s477_s12   ;;  %s477_s12 = sphi %s501_s12, %s645_s12   ;;  %s473_s11 = sphi %s499_s11, %s644_s11   ;;  %s469_s10 = sphi %s497_s10, %s643_s10   ;;  %s465_s9 = sphi %s495_s9, %s642_s9  }
   0x7   : > { %p39_p0 = scmp.ne.s32.totalorder %s469_s10, %s465_s9  ;;  %p40_p1 = scmp.eq.s32.totalorder %s516_s13, 0 }
   0x8   : > { %p84_p2 = scmp.eq.s32.totalorder %s516_s13, 1  ;;  %p90_p3 = scmp.eq.s32.totalorder %s276_s14, 1 }
   0x9   : > { %p525_p4 = por %p40_p1, %p39_p0  ;;  %p277_p5 = scmp.ge.s32.totalorder %s477_s12, 1 }
   0xa   : > { %p530_p6 = por %p90_p3, %p39_p0  ;;  %p97_p7 = scmp.lt.s32.totalorder %s477_s12, 3 }
   0xb   : > { %s109_s19 = sshll.u32 %s634_s1, 4  ;;  %s479_s21 = smov [#allocation5]   ;;  %s110_s19 = int_to_ptr.hbm [resolvable:$true] %s109_s19 }
   0xc   : > { %p538_p8 = pnand %p277_p5, %p97_p7  ;;  %s111_s22 = sshll.u32 %s479_s21, 4  ;;  %s112_s22 = int_to_ptr.vmem [resolvable:$true] %s111_s22 }
   0xd   : > { %s548_s23 = sadd.s32 1, %s477_s12   ;;  %s26_s24 = sadd.s32 1, %s473_s11 }
   0xe   : > { %p298_p10 = pneg %p538_p8  ;;  %s23_s25 = ssub.s32 %s477_s12, %s548_s23 }
   0xf   : > { %p24_p12 = scmp.eq.s32.totalorder %s23_s25, 0  ;;  %p33_p13 = scmp.ne.s32.totalorder %s473_s11, %s469_s10 }
  0x10   : > { %p299_p11 = pnand %p298_p10, %p40_p1  ;;  %p34_p0 = scmp.eq.s32.totalorder %s477_s12, 0 }
  0x11   : > { %s557_s26 = scalar_select %p24_p12, %s473_s11, %s26_s24  }
  0x12   : > { %301 = dma.hbm_to_vmem [thread:$0]  (!%p299_p11), %s110_s19, 32, %s112_s22, [#allocation6]  }
  0x13   : > { %p561_p3 = por %p84_p2, %p33_p13  ;;  %p311_p5 = scmp.lt.s32.totalorder %s477_s12, 2 }
  0x14   : > { %s122_s28 = sand.u32 1, %s473_s11   ;;  %s281_s29 = sshll.u32 %s477_s12, 1 }
  0x15   : > { %p35_p7 = por %p34_p0, %p33_p13  ;;  %s280_s30 = sshll.u32 %s122_s28, 1 }
  0x16   : > { %s130_s5 = scalar_lea.hbm %s633_s0, %s281_s29  ;;  %s126_s7 = scalar_lea.vmem [#allocation2], %s280_s30 }
  0x17   : > { %s132_s6 = sshll.u32 %s130_s5, 4  ;;  %s134_s8 = sshll.u32 %s126_s7, 4  ;;  %s133_s6 = int_to_ptr.hbm [resolvable:$true] %s132_s6  ;;  %s135_s8 = int_to_ptr.vmem [resolvable:$true] %s134_s8 }
  0x18   : > { %p571_p10 = pnand %p311_p5, %p35_p7  ;;  %s123_s17 = scalar_lea.sflag [#allocation3], %s122_s28 }
  0x19   : > { %s377_s18 = sshra.s32 %s133_s6, 4  ;;  %s384_s24 = scalar_lea.hbm %s633_s0, 4  ;;  %s378_s18 = int_to_ptr.hbm [resolvable:$true] %s377_s18 }
  0x1a   : > { %s379_s19 = scalar_lea.hbm %s378_s18, 2  ;;  %p381_p11 = pneg %p571_p10 }
  0x1b   : > { %p380_p2 = scmp.ne.s32.totalorder %s378_s18, %s379_s19  ;;  %p385_p0 = scmp.lt.s32.totalorder %s378_s18, %s633_s0 }
  0x1c   : > { %p386_p5 = scmp.lt.s32.totalorder %s384_s24, %s379_s19 }
  0x1d   : > { %p382_p12 = pnand %p381_p11, %p380_p2 }
  0x1e   : > { %p387_p7 = por %p386_p5, %p385_p0 }
  0x1f   : > { %p383_p13 = pneg %p382_p12 }
  0x21   : > { %p388_p9 = pnand %p387_p7, %p383_p13 }
  0x23   : > { %391 = shalt.err (!%p388_p9)
}
  0x24   : > { %305 = dma.hbm_to_vmem [thread:$0]  (!%p571_p10), %s133_s6, 32, %s135_s8, %s123_s17  }
  0x25   : > { %143 = sbr.rel (%p538_p8) target bundleno = 60 (0x3c), region = 28  ;;  %s588_s28 = sand.u32 (!%p538_p8), 1, %s469_s10  }
  0x26   : > { %s283_s30 = sshll.u32 (!%p538_p8), %s588_s28, 1  ;;  %s146_s3 = scalar_lea.sflag (!%p538_p8), [#allocation3], %s588_s28 }
  0x27   : > { %s149_s4 = scalar_lea.vmem (!%p538_p8), [#allocation2], %s283_s30 }
  0x2a   : > { %452 = dma.done.wait (%p525_p4), %s146_s3, 32  }
  0x2b   : > { %454 = vsyncadd (%p525_p4), %s146_s3, 4294967264 }
  0x2c   : > { %456 = dma.done.wait (%p40_p1), [#allocation6], 32  }
  0x2d   : > { %458 = vsyncadd (%p40_p1), [#allocation6], 4294967264  ;;  %s287_s20 = sshll.u32 %s516_s13, 1  ;;  %s175_s8 = scalar_lea.vmem [#allocation7], %s283_s30  ;;  %v176_v0 = vld [vmem:[%s149_s4] sm:$0x3] }
  0x2e   : > { %s191_s7 = scalar_lea.hbm %s635_s2, %s287_s20  ;;  %s193_s14 = sshll.u32 %s175_s8, 4  ;;  %v177_v1 = vld [vmem:[#allocation5] sm:$0x3]  ;;  %s194_s14 = int_to_ptr.vmem [resolvable:$true] %s193_s14 }
  0x2f   : > { %s195_s17 = sshll.u32 %s191_s7, 4  ;;  %v178_v2 = vadd.f32 %v177_v1, %v176_v0  ;;  %s181_s15 = scalar_lea.sflag [#allocation4], %s588_s28  ;;  %s196_s17 = int_to_ptr.hbm [resolvable:$true] %s195_s17 }
  0x30   : > { %s421_s18 = sshra.s32 %s196_s17, 4  ;;  %s427_s22 = scalar_lea.hbm %s635_s2, 4  ;;  %s422_s18 = int_to_ptr.hbm [resolvable:$true] %s421_s18 }
  0x31   : > { %179 = vst [vmem:[%s175_s8] sm:$0x3] %v178_v2  ;;  %s423_s19 = scalar_lea.hbm %s422_s18, 2  ;;  %p428_p9 = scmp.lt.s32.totalorder %s422_s18, %s635_s2 }
  0x32   : > { %p424_p1 = scmp.ne.s32.totalorder %s422_s18, %s423_s19  ;;  %p429_p10 = scmp.lt.s32.totalorder %s427_s22, %s423_s19 }
  0x34   : > { %p425_p4 = pnand %p424_p1, %p561_p3  ;;  %p430_p2 = por %p429_p10, %p428_p9 }
  0x36   : > { %p426_p8 = pneg %p425_p4 }
  0x38   : > { %p431_p11 = pnand %p430_p2, %p426_p8 }
  0x3a   : > { %434 = shalt.err (!%p431_p11)
}
  0x3b   : > { %296 = dma.vmem_to_hbm [thread:$0]  (%p561_p3), %s194_s14, 32, %s196_s17, %s181_s15  }
  0x3c PF: > { %s207_s29 = sand.u32 1, %s465_s9   ;;  %p641_p12 = scmp.ge.s32.totalorder %s477_s12, 2 }
  0x3d   : > { %s208_s28 = scalar_lea.sflag [#allocation4], %s207_s29 }
  0x3e   : > { %p307_p13 = pnand %p641_p12, %p530_p6 }
  0x40   : > { %p308_p0 = pneg %p307_p13 }
  0x42   : > { %460 = dma.done.wait (%p308_p0), %s208_s28, 32  }
  0x43   : > { %462 = vsyncadd (%p308_p0), %s208_s28, 4294967264  ;;  %p16_p5 = scmp.ge.s32.totalorder %s548_s23, 4   ;;  %s642_s9 = smov %s469_s10 }
  0x44   : > { %s643_s10 = smov %s473_s11  ;;  %s644_s11 = smov %s557_s26 }
  0x45   : > { %s645_s12 = smov %s548_s23  ;;  %18 = sbr.rel (!%p16_p5) target bundleno = 6 (0x6), region = 77 }
  0x4a   :  { %214 = vsyncpa [#allocation3], 1 }
  0x4b   :  { %216 = vsyncpa [#allocation3 + $0x1], 1 }
  0x4c   :  { %217 = vsyncpa [#allocation6], 1 }
  0x4d   :  { %218 = vsyncpa [#allocation4], 1 }
  0x4e   :  { %220 = vsyncpa [#allocation4 + $0x1], 1 }

</bundles_post_ra>
